<compile_context>
chip_gen: v7x
topology: tpu7x:2x2x1
jax: 0.10.0
libtpu: 0.0.40
codegen_flags: <defaults>
</compile_context>

<pallas_src>
import functools

import jax
import jax.numpy as jnp
from jax import lax
from jax.experimental import pallas as pl
from jax.experimental.pallas import tpu as pltpu


# ----------------------------- Pallas kernel ------------------------------


def _tcn_fused_kernel(x_ref, *refs, layer_cfgs, seq_len):
    """Fused TCN forward for one batch tile.

    x_ref:  (C_in0, Lb) activation block, Lb = batch_tile * seq_len.
    refs:   [W1_0, W2_0, W1_1, W2_1, ..., o_ref]; W* are bias-folded stacked
            conv weights (see wrapper), o_ref is (C_final, Lb).
    layer_cfgs: tuple of (c_out, shifts, has_downsample) static per-layer cfg.
    """
    o_ref = refs[-1]
    w_refs = refs[:-1]

    h = x_ref[...].astype(jnp.float32)          # (C, Lb)
    Lb = h.shape[-1]

    def stack_taps(a, shifts):
        """Concat causally-shifted copies of `a` along sublanes + bias row."""
        C = a.shape[0]
        lane_mod = lax.broadcasted_iota(jnp.int32, (C, Lb), 1) % seq_len
        pieces = []
        for s in shifts:                          # static python ints
            if s == 0:
                pieces.append(a)
            else:
                shifted = pltpu.roll(a, shift=s, axis=1)
                # (lane % L) >= s : zero out positions whose source crossed a
                # sample boundary (causal zero padding per sample).
                pieces.append(jnp.where(lane_mod >= s, shifted, 0.0))
        pieces.append(jnp.ones((1, Lb), jnp.float32))   # bias row
        return jnp.concatenate(pieces, axis=0)    # (len(shifts)*C + 1, Lb)

    wi = 0
    for c_out, shifts, has_ds in layer_cfgs:      # unrolled at trace time
        w1 = w_refs[wi][...]
        w2 = w_refs[wi + 1][...]
        wi += 2

        # conv1 (+ folded 1x1 downsample rows) in one MXU matmul.
        y1 = jnp.dot(w1, stack_taps(h, shifts),
                     preferred_element_type=jnp.float32)
        if has_ds:
            h1 = jnp.maximum(y1[:c_out], 0.0)     # conv1 -> ReLU
            res = y1[c_out:]                      # downsample(x)
        else:
            h1 = jnp.maximum(y1, 0.0)
            res = h                               # identity residual
        # dropout(p=0.2) is identity at inference time.

        # conv2 -> ReLU, then residual add -> ReLU.
        y2 = jnp.dot(w2, stack_taps(h1, shifts),
                     preferred_element_type=jnp.float32)
        h = jnp.maximum(jnp.maximum(y2, 0.0) + res, 0.0)

    o_ref[...] = h.astype(o_ref.dtype)


# ------------------------------ JAX wrapper -------------------------------


def _full_spec(shape):
    nd = len(shape)
    return pl.BlockSpec(shape, lambda g: (0,) * nd)


def _stack_conv_weight(w, b, dilation, L):
    """w: (C_out, C_in, K), b: (C_out,) -> (W_stacked, shifts).

    Column blocks are ordered by tap k (causal shift s_k=(K-1-k)*dilation),
    followed by the bias column.  Taps with s_k >= L (fully masked) are
    pruned statically.
    """
    c_out, _, K = w.shape
    cols, shifts = [], []
    for k in range(K):
        s = (K - 1 - k) * dilation
        if s >= L:
            continue
        cols.append(w[:, :, k])
        shifts.append(s)
    W = jnp.concatenate(cols + [b.reshape(c_out, 1)], axis=1)
    return W, tuple(shifts)


def _fold_downsample(W1, shifts, c_in, wd, bd):
    """Append the 1x1 downsample conv as extra output rows of W1."""
    c_out = wd.shape[0]
    n_cols = W1.shape[1]
    z = shifts.index(0)                       # 1x1 conv lives on the shift-0 tap
    rows = jnp.zeros((c_out, n_cols), W1.dtype)
    rows = rows.at[:, z * c_in:(z + 1) * c_in].set(wd)
    rows = rows.at[:, -1].set(bd)
    return jnp.concatenate([W1, rows], axis=0)    # (2*C_out, n_cols)


def _pick_batch_tile(N, L, lane_budget=2048):
    """Largest divisor of N whose lane extent fits the budget, preferring
    >= 2 grid steps so v7x can shard across its 2 TensorCores."""
    divisors = [d for d in range(1, N + 1) if N % d == 0 and d * L <= lane_budget]
    if not divisors:
        return 1
    multi_step = [d for d in divisors if N // d >= 2]
    return max(multi_step) if multi_step else max(divisors)


def temporal_conv_net(x, blocks, *, batch_tile=None):
    """TemporalConvNet forward.  x: (N, C_in, L) -> (N, C_out_last, L)."""
    N, c_in0, L = x.shape

    # ---- pre-stack all conv weights (bias folded, downsample folded) ----
    layer_cfgs = []
    weight_args = []
    c_prev = c_in0
    for params, dilation in blocks:
        c_out = params["w1"].shape[0]
        W1, shifts = _stack_conv_weight(params["w1"], params["b1"], dilation, L)
        W2, shifts2 = _stack_conv_weight(params["w2"], params["b2"], dilation, L)
        assert shifts == shifts2
        has_ds = "wd" in params
        if has_ds:
            W1 = _fold_downsample(W1, shifts, c_prev, params["wd"], params["bd"])
        weight_args += [W1, W2]
        layer_cfgs.append((c_out, shifts, has_ds))
        c_prev = c_out
    c_final = c_prev

    # ---- fold batch onto the lane axis: (N, C, L) -> (C, N*L) ----
    if batch_tile is None:
        batch_tile = _pick_batch_tile(N, L)
    assert N % batch_tile == 0
    Lb = batch_tile * L
    grid = (N // batch_tile,)
    x_flat = jnp.transpose(x, (1, 0, 2)).reshape(c_in0, N * L)

    kernel = functools.partial(_tcn_fused_kernel,
                               layer_cfgs=tuple(layer_cfgs), seq_len=L)

    in_specs = [pl.BlockSpec((c_in0, Lb), lambda g: (0, g))]
    in_specs += [_full_spec(w.shape) for w in weight_args]

    # TODO(synk): for much larger L / channel counts (v7x 64 MiB VMEM), tile
    # the time axis with a receptive-field halo instead of full-L blocks.
    out_flat = pl.pallas_call(
        kernel,
        out_shape=jax.ShapeDtypeStruct((c_final, N * L), x.dtype),
        grid_spec=pltpu.PrefetchScalarGridSpec(
            num_scalar_prefetch=0,
            grid=grid,
            in_specs=in_specs,
            out_specs=pl.BlockSpec((c_final, Lb), lambda g: (0, g)),
        ),
        compiler_params=pltpu.CompilerParams(
            dimension_semantics=("parallel",)),
    )(x_flat, *weight_args)

    return out_flat.reshape(c_final, N, L).transpose(1, 0, 2)


# --------------------------- parameter creation ---------------------------


def make_tcn_params(key, num_inputs, num_channels, kernel_size):
    """PyTorch-equivalent params.  weight_norm with default init (g = ||v||)
    makes the effective weight equal to the raw N(0, 0.01) init."""
    blocks = []
    c_in = num_inputs
    for i, c_out in enumerate(num_channels):
        dilation = 2 ** i
        key, k1, k2, k3, k4, k5, k6 = jax.random.split(key, 7)
        w1 = 0.01 * jax.random.normal(k1, (c_out, c_in, kernel_size), jnp.float32)
        w2 = 0.01 * jax.random.normal(k2, (c_out, c_out, kernel_size), jnp.float32)
        b1_bound = (c_in * kernel_size) ** -0.5
        b2_bound = (c_out * kernel_size) ** -0.5
        b1 = jax.random.uniform(k3, (c_out,), jnp.float32, -b1_bound, b1_bound)
        b2 = jax.random.uniform(k4, (c_out,), jnp.float32, -b2_bound, b2_bound)
        params = {"w1": w1, "b1": b1, "w2": w2, "b2": b2}
        if c_in != c_out:
            wd = 0.01 * jax.random.normal(k5, (c_out, c_in), jnp.float32)
            bd_bound = c_in ** -0.5
            bd = jax.random.uniform(k6, (c_out,), jnp.float32, -bd_bound, bd_bound)
            params["wd"] = wd
            params["bd"] = bd
        blocks.append((params, dilation))
        c_in = c_out
    return blocks


# ------------------------------ pure-JAX ref ------------------------------


def _ref_causal_conv(x, w, b, dilation):
    # x: (N, C_in, L), w: (C_out, C_in, K), b: (C_out,)
    K = w.shape[-1]
    P = (K - 1) * dilation
    L = x.shape[-1]
    y = lax.conv_general_dilated(
        x, w, window_strides=(1,), padding=[(P, P)],
        rhs_dilation=(dilation,), dimension_numbers=("NCH", "OIH", "NCH"))
    return y[:, :, :L] + b[None, :, None]       # Chomp1d + bias


def _ref_block(x, params, dilation):
    h = jax.nn.relu(_ref_causal_conv(x, params["w1"], params["b1"], dilation))
    h = jax.nn.relu(_ref_causal_conv(h, params["w2"], params["b2"], dilation))
    if "wd" in params:
        res = jnp.einsum("oc,ncl->nol", params["wd"], x) + params["bd"][None, :, None]
    else:
        res = x
    return jax.nn.relu(h + res)


def _ref_tcn(x, blocks):
    for params, dilation in blocks:
        x = _ref_block(x, params, dilation)
    return x


# ---------------------------------- main ----------------------------------


if __name__ == "__main__":
    key = jax.random.PRNGKey(0)
    kx, kp = jax.random.split(key)

    # Small TCN: num_inputs=8, num_channels=[16, 16], kernel_size=2
    num_inputs, num_channels, kernel_size = 8, [16, 16], 2
    N, L = 4, 128   # batch, sequence length (lane-aligned)

    x = jax.random.normal(kx, (N, num_inputs, L), jnp.float32)
    blocks = make_tcn_params(kp, num_inputs, num_channels, kernel_size)

    out = jax.block_until_ready(temporal_conv_net(x, blocks))
    ref = jax.block_until_ready(_ref_tcn(x, blocks))

    assert out.shape == (N, num_channels[-1], L)
    assert jnp.allclose(out, ref, atol=1e-4, rtol=1e-4), "mismatch vs JAX reference"

    # TODO(synk): dropout layers are identity at inference; training-mode dropout not implemented.
    print("KERNEL_OK")
</pallas_src>

<mosaic_0001>
module attributes {stable_mosaic.version = 11 : i64} {
  func.func @_tcn_fused_kernel(%arg0: i32, %arg1: memref<8x256xf32, #tpu.memory_space<vmem>>, %arg2: memref<32x17xf32, #tpu.memory_space<vmem>>, %arg3: memref<16x33xf32, #tpu.memory_space<vmem>>, %arg4: memref<16x33xf32, #tpu.memory_space<vmem>>, %arg5: memref<16x33xf32, #tpu.memory_space<vmem>>, %arg6: memref<16x256xf32, #tpu.memory_space<vmem>>) attributes {dimension_semantics = [#tpu.dimension_semantics<parallel>], iteration_bounds = array<i64: 2>, scalar_prefetch = 0 : i64, scratch_operands = 0 : i64, tpu.core_type = #tpu.core_type<tc>, window_params = [{transform_indices = @transform_0, window_bounds = array<i64: 8, 256>}, {pipeline_mode = #tpu.pipeline_mode<synchronous>, transform_indices = @transform_1, window_bounds = array<i64: 32, 17>}, {pipeline_mode = #tpu.pipeline_mode<synchronous>, transform_indices = @transform_2, window_bounds = array<i64: 16, 33>}, {pipeline_mode = #tpu.pipeline_mode<synchronous>, transform_indices = @transform_3, window_bounds = array<i64: 16, 33>}, {pipeline_mode = #tpu.pipeline_mode<synchronous>, transform_indices = @transform_4, window_bounds = array<i64: 16, 33>}, {transform_indices = @transform_5, window_bounds = array<i64: 16, 256>}]} {
    %c0 = arith.constant 0 : index
    %c0_0 = arith.constant 0 : index
    %0 = vector.load %arg1[%c0, %c0_0] : memref<8x256xf32, #tpu.memory_space<vmem>>, vector<8x256xf32>
    %c0_1 = arith.constant 0 : index
    %c0_2 = arith.constant 0 : index
    %1 = vector.load %arg2[%c0_1, %c0_2] : memref<32x17xf32, #tpu.memory_space<vmem>>, vector<32x17xf32>
    %c0_3 = arith.constant 0 : index
    %c0_4 = arith.constant 0 : index
    %2 = vector.load %arg3[%c0_3, %c0_4] : memref<16x33xf32, #tpu.memory_space<vmem>>, vector<16x33xf32>
    %3 = tpu.iota {dimensions = array<i32: 1>} : vector<8x256xi32>
    %c128_i32 = arith.constant 128 : i32
    %c0_i32 = arith.constant 0 : i32
    %4 = arith.cmpi eq, %c128_i32, %c0_i32 : i32
    %c1_i32 = arith.constant 1 : i32
    %5 = arith.select %4, %c1_i32, %c128_i32 : i32
    %6 = vector.broadcast %5 : i32 to vector<8x256xi32>
    %7 = arith.remsi %3, %6 : vector<8x256xi32>
    %c0_i32_5 = arith.constant 0 : i32
    %8 = vector.broadcast %c0_i32_5 : i32 to vector<8x256xi32>
    %9 = arith.cmpi ne, %7, %8 : vector<8x256xi32>
    %c0_i32_6 = arith.constant 0 : i32
    %10 = vector.broadcast %c0_i32_6 : i32 to vector<8x256xi32>
    %11 = arith.cmpi slt, %7, %10 : vector<8x256xi32>
    %c0_i32_7 = arith.constant 0 : i32
    %12 = arith.cmpi slt, %5, %c0_i32_7 : i32
    %13 = vector.broadcast %12 : i1 to vector<8x256xi1>
    %14 = vector.broadcast %13 : vector<8x256xi1> to vector<8x256xi1>
    %15 = arith.xori %11, %14 : vector<8x256xi1>
    %16 = arith.andi %15, %9 : vector<8x256xi1>
    %17 = vector.broadcast %5 : i32 to vector<8x256xi32>
    %18 = arith.addi %7, %17 : vector<8x256xi32>
    %19 = arith.select %16, %18, %7 : vector<8x256xi1>, vector<8x256xi32>
    %c1_i32_8 = arith.constant 1 : i32
    %20 = tpu.dynamic_rotate %0 by %c1_i32_8 dim 1 : vector<8x256xf32>, i32 -> vector<8x256xf32>
    %c1_i32_9 = arith.constant 1 : i32
    %21 = vector.broadcast %c1_i32_9 : i32 to vector<8x256xi32>
    %22 = arith.cmpi sge, %19, %21 : vector<8x256xi32>
    %cst = arith.constant 0.000000e+00 : f32
    %23 = vector.broadcast %cst : f32 to vector<8x256xf32>
    %24 = arith.select %22, %20, %23 : vector<8x256xi1>, vector<8x256xf32>
    %cst_10 = arith.constant 1.000000e+00 : f32
    %25 = vector.broadcast %cst_10 : f32 to vector<1x256xf32>
    %26 = tpu.concatenate %24, %0, %25 in 0 : vector<8x256xf32>, vector<8x256xf32>, vector<1x256xf32> -> vector<17x256xf32>
    %cst_11 = arith.constant dense<0.000000e+00> : vector<32x256xf32>
    %27 = tpu.matmul %1, %26, %cst_11 {dimension_numbers = #tpu.dot_dimension_numbers<[1], [0], [0], [1], [0, 0, 1, 1], [], []>} : vector<32x17xf32>, vector<17x256xf32>, vector<32x256xf32> -> vector<32x256xf32>
    %28 = vector.extract_strided_slice %27 {offsets = [0, 0], sizes = [16, 256], strides = [1, 1]} : vector<32x256xf32> to vector<16x256xf32>
    %cst_12 = arith.constant 0.000000e+00 : f32
    %29 = vector.broadcast %cst_12 : f32 to vector<16x256xf32>
    %30 = arith.maximumf %28, %29 : vector<16x256xf32>
    %31 = vector.extract_strided_slice %27 {offsets = [16, 0], sizes = [16, 256], strides = [1, 1]} : vector<32x256xf32> to vector<16x256xf32>
    %32 = tpu.iota {dimensions = array<i32: 1>} : vector<16x256xi32>
    %c128_i32_13 = arith.constant 128 : i32
    %c0_i32_14 = arith.constant 0 : i32
    %33 = arith.cmpi eq, %c128_i32_13, %c0_i32_14 : i32
    %c1_i32_15 = arith.constant 1 : i32
    %34 = arith.select %33, %c1_i32_15, %c128_i32_13 : i32
    %35 = vector.broadcast %34 : i32 to vector<16x256xi32>
    %36 = arith.remsi %32, %35 : vector<16x256xi32>
    %c0_i32_16 = arith.constant 0 : i32
    %37 = vector.broadcast %c0_i32_16 : i32 to vector<16x256xi32>
    %38 = arith.cmpi ne, %36, %37 : vector<16x256xi32>
    %c0_i32_17 = arith.constant 0 : i32
    %39 = vector.broadcast %c0_i32_17 : i32 to vector<16x256xi32>
    %40 = arith.cmpi slt, %36, %39 : vector<16x256xi32>
    %c0_i32_18 = arith.constant 0 : i32
    %41 = arith.cmpi slt, %34, %c0_i32_18 : i32
    %42 = vector.broadcast %41 : i1 to vector<16x256xi1>
    %43 = vector.broadcast %42 : vector<16x256xi1> to vector<16x256xi1>
    %44 = arith.xori %40, %43 : vector<16x256xi1>
    %45 = arith.andi %44, %38 : vector<16x256xi1>
    %46 = vector.broadcast %34 : i32 to vector<16x256xi32>
    %47 = arith.addi %36, %46 : vector<16x256xi32>
    %48 = arith.select %45, %47, %36 : vector<16x256xi1>, vector<16x256xi32>
    %c1_i32_19 = arith.constant 1 : i32
    %49 = tpu.dynamic_rotate %30 by %c1_i32_19 dim 1 : vector<16x256xf32>, i32 -> vector<16x256xf32>
    %c1_i32_20 = arith.constant 1 : i32
    %50 = vector.broadcast %c1_i32_20 : i32 to vector<16x256xi32>
    %51 = arith.cmpi sge, %48, %50 : vector<16x256xi32>
    %cst_21 = arith.constant 0.000000e+00 : f32
    %52 = vector.broadcast %cst_21 : f32 to vector<16x256xf32>
    %53 = arith.select %51, %49, %52 : vector<16x256xi1>, vector<16x256xf32>
    %cst_22 = arith.constant 1.000000e+00 : f32
    %54 = vector.broadcast %cst_22 : f32 to vector<1x256xf32>
    %55 = tpu.concatenate %53, %30, %54 in 0 : vector<16x256xf32>, vector<16x256xf32>, vector<1x256xf32> -> vector<33x256xf32>
    %cst_23 = arith.constant dense<0.000000e+00> : vector<16x256xf32>
    %56 = tpu.matmul %2, %55, %cst_23 {dimension_numbers = #tpu.dot_dimension_numbers<[1], [0], [0], [1], [0, 0, 1, 1], [], []>} : vector<16x33xf32>, vector<33x256xf32>, vector<16x256xf32> -> vector<16x256xf32>
    %cst_24 = arith.constant 0.000000e+00 : f32
    %57 = vector.broadcast %cst_24 : f32 to vector<16x256xf32>
    %58 = arith.maximumf %56, %57 : vector<16x256xf32>
    %59 = arith.addf %58, %31 : vector<16x256xf32>
    %cst_25 = arith.constant 0.000000e+00 : f32
    %60 = vector.broadcast %cst_25 : f32 to vector<16x256xf32>
    %61 = arith.maximumf %59, %60 : vector<16x256xf32>
    %c0_26 = arith.constant 0 : index
    %c0_27 = arith.constant 0 : index
    %62 = vector.load %arg4[%c0_26, %c0_27] : memref<16x33xf32, #tpu.memory_space<vmem>>, vector<16x33xf32>
    %c0_28 = arith.constant 0 : index
    %c0_29 = arith.constant 0 : index
    %63 = vector.load %arg5[%c0_28, %c0_29] : memref<16x33xf32, #tpu.memory_space<vmem>>, vector<16x33xf32>
    %64 = tpu.iota {dimensions = array<i32: 1>} : vector<16x256xi32>
    %c128_i32_30 = arith.constant 128 : i32
    %c0_i32_31 = arith.constant 0 : i32
    %65 = arith.cmpi eq, %c128_i32_30, %c0_i32_31 : i32
    %c1_i32_32 = arith.constant 1 : i32
    %66 = arith.select %65, %c1_i32_32, %c128_i32_30 : i32
    %67 = vector.broadcast %66 : i32 to vector<16x256xi32>
    %68 = arith.remsi %64, %67 : vector<16x256xi32>
    %c0_i32_33 = arith.constant 0 : i32
    %69 = vector.broadcast %c0_i32_33 : i32 to vector<16x256xi32>
    %70 = arith.cmpi ne, %68, %69 : vector<16x256xi32>
    %c0_i32_34 = arith.constant 0 : i32
    %71 = vector.broadcast %c0_i32_34 : i32 to vector<16x256xi32>
    %72 = arith.cmpi slt, %68, %71 : vector<16x256xi32>
    %c0_i32_35 = arith.constant 0 : i32
    %73 = arith.cmpi slt, %66, %c0_i32_35 : i32
    %74 = vector.broadcast %73 : i1 to vector<16x256xi1>
    %75 = vector.broadcast %74 : vector<16x256xi1> to vector<16x256xi1>
    %76 = arith.xori %72, %75 : vector<16x256xi1>
    %77 = arith.andi %76, %70 : vector<16x256xi1>
    %78 = vector.broadcast %66 : i32 to vector<16x256xi32>
    %79 = arith.addi %68, %78 : vector<16x256xi32>
    %80 = arith.select %77, %79, %68 : vector<16x256xi1>, vector<16x256xi32>
    %c2_i32 = arith.constant 2 : i32
    %81 = tpu.dynamic_rotate %61 by %c2_i32 dim 1 : vector<16x256xf32>, i32 -> vector<16x256xf32>
    %c2_i32_36 = arith.constant 2 : i32
    %82 = vector.broadcast %c2_i32_36 : i32 to vector<16x256xi32>
    %83 = arith.cmpi sge, %80, %82 : vector<16x256xi32>
    %cst_37 = arith.constant 0.000000e+00 : f32
    %84 = vector.broadcast %cst_37 : f32 to vector<16x256xf32>
    %85 = arith.select %83, %81, %84 : vector<16x256xi1>, vector<16x256xf32>
    %cst_38 = arith.constant 1.000000e+00 : f32
    %86 = vector.broadcast %cst_38 : f32 to vector<1x256xf32>
    %87 = tpu.concatenate %85, %61, %86 in 0 : vector<16x256xf32>, vector<16x256xf32>, vector<1x256xf32> -> vector<33x256xf32>
    %cst_39 = arith.constant dense<0.000000e+00> : vector<16x256xf32>
    %88 = tpu.matmul %62, %87, %cst_39 {dimension_numbers = #tpu.dot_dimension_numbers<[1], [0], [0], [1], [0, 0, 1, 1], [], []>} : vector<16x33xf32>, vector<33x256xf32>, vector<16x256xf32> -> vector<16x256xf32>
    %cst_40 = arith.constant 0.000000e+00 : f32
    %89 = vector.broadcast %cst_40 : f32 to vector<16x256xf32>
    %90 = arith.maximumf %88, %89 : vector<16x256xf32>
    %91 = tpu.iota {dimensions = array<i32: 1>} : vector<16x256xi32>
    %c128_i32_41 = arith.constant 128 : i32
    %c0_i32_42 = arith.constant 0 : i32
    %92 = arith.cmpi eq, %c128_i32_41, %c0_i32_42 : i32
    %c1_i32_43 = arith.constant 1 : i32
    %93 = arith.select %92, %c1_i32_43, %c128_i32_41 : i32
    %94 = vector.broadcast %93 : i32 to vector<16x256xi32>
    %95 = arith.remsi %91, %94 : vector<16x256xi32>
    %c0_i32_44 = arith.constant 0 : i32
    %96 = vector.broadcast %c0_i32_44 : i32 to vector<16x256xi32>
    %97 = arith.cmpi ne, %95, %96 : vector<16x256xi32>
    %c0_i32_45 = arith.constant 0 : i32
    %98 = vector.broadcast %c0_i32_45 : i32 to vector<16x256xi32>
    %99 = arith.cmpi slt, %95, %98 : vector<16x256xi32>
    %c0_i32_46 = arith.constant 0 : i32
    %100 = arith.cmpi slt, %93, %c0_i32_46 : i32
    %101 = vector.broadcast %100 : i1 to vector<16x256xi1>
    %102 = vector.broadcast %101 : vector<16x256xi1> to vector<16x256xi1>
    %103 = arith.xori %99, %102 : vector<16x256xi1>
    %104 = arith.andi %103, %97 : vector<16x256xi1>
    %105 = vector.broadcast %93 : i32 to vector<16x256xi32>
    %106 = arith.addi %95, %105 : vector<16x256xi32>
    %107 = arith.select %104, %106, %95 : vector<16x256xi1>, vector<16x256xi32>
    %c2_i32_47 = arith.constant 2 : i32
    %108 = tpu.dynamic_rotate %90 by %c2_i32_47 dim 1 : vector<16x256xf32>, i32 -> vector<16x256xf32>
    %c2_i32_48 = arith.constant 2 : i32
    %109 = vector.broadcast %c2_i32_48 : i32 to vector<16x256xi32>
    %110 = arith.cmpi sge, %107, %109 : vector<16x256xi32>
    %cst_49 = arith.constant 0.000000e+00 : f32
    %111 = vector.broadcast %cst_49 : f32 to vector<16x256xf32>
    %112 = arith.select %110, %108, %111 : vector<16x256xi1>, vector<16x256xf32>
    %cst_50 = arith.constant 1.000000e+00 : f32
    %113 = vector.broadcast %cst_50 : f32 to vector<1x256xf32>
    %114 = tpu.concatenate %112, %90, %113 in 0 : vector<16x256xf32>, vector<16x256xf32>, vector<1x256xf32> -> vector<33x256xf32>
    %cst_51 = arith.constant dense<0.000000e+00> : vector<16x256xf32>
    %115 = tpu.matmul %63, %114, %cst_51 {dimension_numbers = #tpu.dot_dimension_numbers<[1], [0], [0], [1], [0, 0, 1, 1], [], []>} : vector<16x33xf32>, vector<33x256xf32>, vector<16x256xf32> -> vector<16x256xf32>
    %cst_52 = arith.constant 0.000000e+00 : f32
    %116 = vector.broadcast %cst_52 : f32 to vector<16x256xf32>
    %117 = arith.maximumf %115, %116 : vector<16x256xf32>
    %118 = arith.addf %117, %61 : vector<16x256xf32>
    %cst_53 = arith.constant 0.000000e+00 : f32
    %119 = vector.broadcast %cst_53 : f32 to vector<16x256xf32>
    %120 = arith.maximumf %118, %119 : vector<16x256xf32>
    %c0_54 = arith.constant 0 : index
    %c0_55 = arith.constant 0 : index
    %121 = vector.load %arg6[%c0_54, %c0_55] : memref<16x256xf32, #tpu.memory_space<vmem>>, vector<16x256xf32>
    tpu.vector_store %arg6[%c0_54, %c0_55], %120 {strides = array<i32>} : memref<16x256xf32, #tpu.memory_space<vmem>>, vector<16x256xf32>,
    return
  }
  func.func @transform_0(%arg0: i32) -> (i32, i32) {
    %c0_i32 = arith.constant 0 : i32
    %c0_i32_0 = arith.constant 0 : i32
    return %c0_i32, %arg0 : i32, i32
  }
  func.func @transform_1(%arg0: i32) -> (i32, i32) {
    %c0_i32 = arith.constant 0 : i32
    %c0_i32_0 = arith.constant 0 : i32
    %c0_i32_1 = arith.constant 0 : i32
    return %c0_i32, %c0_i32_0 : i32, i32
  }
  func.func @transform_2(%arg0: i32) -> (i32, i32) {
    %c0_i32 = arith.constant 0 : i32
    %c0_i32_0 = arith.constant 0 : i32
    %c0_i32_1 = arith.constant 0 : i32
    return %c0_i32, %c0_i32_0 : i32, i32
  }
  func.func @transform_3(%arg0: i32) -> (i32, i32) {
    %c0_i32 = arith.constant 0 : i32
    %c0_i32_0 = arith.constant 0 : i32
    %c0_i32_1 = arith.constant 0 : i32
    return %c0_i32, %c0_i32_0 : i32, i32
  }
  func.func @transform_4(%arg0: i32) -> (i32, i32) {
    %c0_i32 = arith.constant 0 : i32
    %c0_i32_0 = arith.constant 0 : i32
    %c0_i32_1 = arith.constant 0 : i32
    return %c0_i32, %c0_i32_0 : i32, i32
  }
  func.func @transform_5(%arg0: i32) -> (i32, i32) {
    %c0_i32 = arith.constant 0 : i32
    %c0_i32_0 = arith.constant 0 : i32
    return %c0_i32, %arg0 : i32, i32
  }
}

</mosaic_0001>

<bundles_post_ra>
// kernel: tpu_custom_call.1
= control target key start
LH: loop header
LB: loop body
LE: loop exit
PB: predicated region body
PF: predicated region fallthrough
CT: control target
= control target key end

     0   :  { %10 = vsyncpa [#allocation3], 0  ;;  %s1443_s0 = inlined_call_operand.vmem [shape: f32[8,512], index: 0, kind: input, shape index: {}]   ;;  %s1444_s1 = inlined_call_operand.vmem [shape: f32[32,17], index: 1, kind: input, shape index: {}]   ;;  %s1445_s2 = inlined_call_operand.vmem [shape: f32[16,33], index: 2, kind: input, shape index: {}]   ;;  %s1446_s3 = inlined_call_operand.vmem [shape: f32[16,33], index: 3, kind: input, shape index: {}]   ;;  %s1447_s4 = inlined_call_operand.hbm [shape: f32[16,33], index: 4, kind: input, shape index: {}]   ;;  %s1448_s5 = inlined_call_operand.hbm [shape: f32[16,512], index: 5, kind: output, shape index: {}]  }
   0x1   :  { %11 = vsyncpa [#allocation4], 0 }
   0x2   :  { %13 = vsyncpa [#allocation4 + $0x1], 0  ;;  %s1138_s18 = smov 0   ;;  %s1140_s19 = smov 0  }
   0x3   :  { %s1142_s20 = smov 0   ;;  %s1144_s21 = smov 0  }
   0x4 LB: > { %s1159_s22 = sadd.s32 4294967295, %s1094_s21   ;;  %s822_s23 = sadd.s32 4294967294, %s1094_s21   ;;  %s1094_s21 = sphi %s1144_s21, %s1470_s21   ;;  %s1090_s20 = sphi %s1142_s20, %s1469_s20   ;;  %s1086_s19 = sphi %s1140_s19, %s1468_s19   ;;  %s1082_s18 = sphi %s1138_s18, %s1467_s18  }
   0x5   : > { %s1163_s24 = sadd.s32 1, %s1094_s21   ;;  %s136_s25 = sadd.s32 1, %s1090_s20 }
   0x6   : > { %s133_s26 = ssub.s32 %s1094_s21, %s1163_s24  ;;  %p146_p0 = scmp.ne.s32.totalorder %s1090_s20, %s1086_s19 }
   0x7   : > { %p134_p1 = scmp.eq.s32.totalorder %s133_s26, 0  ;;  %p147_p2 = scmp.eq.s32.totalorder %s1159_s22, 1 }
   0x8   : > { %p152_p3 = scmp.ne.s32.totalorder %s1086_s19, %s1082_s18  ;;  %p153_p4 = scmp.eq.s32.totalorder %s822_s23, 1 }
   0x9   : > { %s1174_s27 = scalar_select %p134_p1, %s1090_s20, %s136_s25  }
   0xa   : > { %p1176_p5 = por %p147_p2, %p146_p0  ;;  %p1180_p6 = por %p153_p4, %p152_p3 }
   0xb   : > { %p823_p7 = scmp.ge.s32.totalorder %s1094_s21, 1  ;;  %p160_p8 = scmp.lt.s32.totalorder %s1094_s21, 3 }
   0xc   : > { %s1452_s28 = scalar_select %p1176_p5, 1, 0 }
   0xd   : > { %s1453_s29 = scalar_select %p1180_p6, 1, 0 }
   0xe   : > { %p1449_p9 = scmp.eq.s32.totalorder %s1159_s22, 0  ;;  %p1187_p10 = pnand %p823_p7, %p160_p8 }
   0xf   : > { %s1096_s6 = smov [#allocation2]   ;;  %s1000_s11 = scalar_lea.hbm %s1447_s4, 256 }
  0x10   : > { %s1454_s30 = scalar_select %p1187_p10, 1, 0 }
  0x11   : > { %s181_s7 = sshll.u32 %s1096_s6, 4  ;;  %p911_p11 = pneg %p1187_p10  ;;  %s182_s7 = int_to_ptr.vmem [resolvable:$true] %s181_s7 }
  0x12   : > { %p1001_p13 = scmp.ne.s32.totalorder %s1447_s4, %s1000_s11  ;;  %p1007_p3 = scmp.lt.u32.totalorder %s1000_s11, %s1447_s4 }
  0x13   : > { %p1195_p12 = pnand %p1449_p9, %p911_p11 }
  0x15   : > { %p1002_p0 = pneg %p1195_p12 }
  0x17   : > { %p1003_p1 = pnand %p1002_p0, %p1001_p13 }
  0x19   : > { %p1004_p2 = pneg %p1003_p1 }
  0x1b   : > { %p1009_p4 = pnand %p1007_p3, %p1004_p2 }
  0x1d   : > { %1012 = shalt.err (!%p1009_p4)
}
  0x1e   : > { %s1013_s16 = scalar_lea.vmem %s182_s7, 256  ;;  %p1021_p9 = scmp.lt.s32.totalorder %s182_s7, %s182_s7 }
  0x1f   : > { %p1014_p7 = scmp.ne.s32.totalorder %s182_s7, %s1013_s16  ;;  %p1022_p6 = scmp.lt.s32.totalorder %s1013_s16, %s1013_s16 }
  0x21   : > { %p1016_p8 = pnand %p1014_p7, %p1002_p0  ;;  %p1023_p5 = por %p1022_p6, %p1021_p9 }
  0x23   : > { %p1017_p11 = pneg %p1016_p8 }
  0x25   : > { %p1024_p10 = pnand %p1023_p5, %p1017_p11 }
  0x27   : > { %1027 = shalt.err (!%p1024_p10)
}
  0x28   : > { %s1097_s17 = smov 128   ;;  %s1098_s23 = smov 8  }
  0x29   : > { %914 = dma.hbm_to_vmem [thread:$0]  (!%p1195_p12), %s1447_s4, 256, %s182_s7, [#allocation3], %s1097_s17, %s1097_s17, %s1098_s23  }
  0x2a   : > { %p1456_p13 = scmp.ne.s32.totalorder %s1454_s30, 0 }
  0x2b   : > { %p1457_p1 = scmp.eq.s32.totalorder (!%p1456_p13), %s1159_s22, 0 }
  0x2c   : > { %206 = sbr.rel (%p1456_p13) target bundleno = 1483 (0x5cb), region = 40 }
  0x33   : > { %1073 = dma.done.wait (%p1457_p1), [#allocation3], 256   ;;  %p1458_p0 = pmov %p1457_p1 }
  0x34   : > { %s829_s6 = sshll.u32 %s1159_s22, 1  ;;  %v1099_v2 = vmov 0.0   ;;  %s1100_s30 = smov 1   ;;  %v249_v4 = vlaneseq  ;;  %vm1101_vm3 = vmmov 1   ;;  %vm300_vm6 = vcmask 1040384   ;;  %v243_v17 = vld [vmem:[%s1444_s1] sm:$0xff] }
  0x35   : > { %1075 = vsyncadd (%p1458_p0), [#allocation3], 4294967040  ;;  %p235_p5 = scmp.lt.s32.totalorder %s829_s6, 3  ;;  %368 = vmatprep.mubr.f32.mxu0 %v1099_v2  ;;  %484 = vmatprep.mubr.f32.mxu1 %v1099_v2  ;;  %v1102_v16 = vmov 1.0   ;;  %vm287_vm7 = vcmask 138240   ;;  %v244_v18 = vld [vmem:[%s1444_s1 + $0x8] sm:$0xff] }
  0x36   : > { %v1228_v5 = vand.u32 127, %v249_v4  ;;  %v245_v31 = vld [vmem:[%s1444_s1 + $0x10] sm:$0xff]  ;;  %v246_v32 = vld [vmem:[%s1444_s1 + $0x18] sm:$0xff]  ;;  %v247_v45 = vld [vmem:[%s1445_s2] sm:$0xff]  ;;  %vm413_vm10 = vcmask 269312   ;;  %s1103_s10 = smov 2  }
  0x37   : > { %s1472_s6 = smov (!%p235_p5, %s829_s6), 3  ;;  %v248_v46 = vld [vmem:[%s1445_s2 + $0x8] sm:$0xff]  ;;  %s231_s12 = sand.u32 1, %s1086_s19  }
  0x38   : > { %s830_s9 = sshll.u32 %s1472_s6, 3  ;;  %v1231_v6 = vadd.s32 128, %v1228_v5  ;;  %vm280_vm0 = vcmp.lt.s32.totalorder %v1228_v5, 1  ;;  %vm283_vm2 = vcmp.ge.s32.totalorder %v1228_v5, 1  ;;  %vm521_vm11 = vcmp.lt.s32.totalorder %v1228_v5, 2  ;;  %s828_s13 = sshll.u32 %s231_s12, 5 }
  0x39   : > { %s238_s11 = scalar_lea.vmem %s1443_s0, %s830_s9  ;;  %vm873_vm5 = vmpackc.low %vm1101_vm3, %vm283_vm2  ;;  %vm526_vm13 = vcmp.ge.s32.totalorder %v1228_v5, 2  ;;  %v512_v5 = vld [vmem:[#allocation2 + $0x8] sm:$0xff]  ;;  %s233_s14 = scalar_lea.vmem [#allocation5], %s828_s13 }
  0x3a   : > { %v241_v0 = vld [vmem:[%s238_s11] sm:$0xff]  ;;  %v242_v1 = vld [vmem:[%s238_s11 + $0x8] sm:$0xff]  ;;  %v263_v7 = vand.u32 127, %v1231_v6  ;;  %vm879_vm9 = vmpackc.low %vm283_vm2, %vm283_vm2  ;;  %s748_s15 = sshll.u32 %s233_s14, 4  ;;  %s868_s16 = sshll.u32 %s1159_s22, 8  ;;  %s1394_s15 = int_to_ptr.vmem [resolvable:$true] %s748_s15 }
  0x3b   : > { %v965_v3 = vpack.i.bf16 %v242_v1, %v241_v0  ;;  %vm1337_vm15 = vmpackc.low %vm526_vm13, %vm526_vm13  ;;  %s1400_s25 = scalar_lea.hbm %s1448_s5, %s868_s16  ;;  %s1402_s22 = scalar_lea.sflag [#allocation4], %s231_s12 }
  0x3c   : > { %vm1237_vm1 = vcmp.ge.s32.totalorder %v263_v7, 1  ;;  %vm1321_vm12 = vcmp.ge.s32.totalorder %v263_v7, 2  ;;  %s1028_s26 = scalar_lea.vmem %s1394_s15, 512  ;;  %p1465_p9 = scmp.ne.s32.totalorder %s1452_s28, 0 }
  0x3d   : > { %966 = vrot.lane.b32.xlu0 %v965_v3, %s1100_s30  ;;  %vm870_vm4 = vmpackc.low %vm1101_vm3, %vm1237_vm1  ;;  %p1029_p6 = scmp.ne.s32.totalorder %s1394_s15, %s1028_s26  ;;  %s1104_s6 = smov [#allocation5]  }
  0x3e   : > { %vm876_vm8 = vmpackc.low %vm1237_vm1, %vm1237_vm1  ;;  %s1032_s9 = sshll.u32 %s1104_s6, 4  ;;  %s1033_s9 = int_to_ptr.vmem [resolvable:$false] %s1032_s9 }
  0x3f   : > { %vm886_vm14 = vmpackc.low %vm1321_vm12, %vm1321_vm12  ;;  %p1030_p10 = pnand %p1029_p6, %p1465_p9  ;;  %p1035_p2 = scmp.lt.s32.totalorder %s1394_s15, %s1033_s9 }
  0x41   : > { %p1031_p12 = pneg %p1030_p10 }
  0xaf   : > { %v967_v8 = vpop.permute.xlu0 %966 }
  0xb0   : > { %v969_v10 = vunpack.i.h.bf16 %v967_v8  ;;  %v968_v11 = vunpack.i.l.bf16 %v967_v8 }
  0xb2   : > { %v281_v12 = vsel %vm280_vm0, %v968_v11, %v969_v10  ;;  %v282_v13 = vsel %vm280_vm0, %v969_v10, %v968_v11 }
  0xb3   : > { %v869_v14 = vpack.c.bf16 %v242_v1, %v281_v12  ;;  %v872_v15 = vpack.c.bf16 %v241_v0, %v282_v13 }
  0xb5   : > { %871 = vmatprep.subr.msk.bf16.mxu0 %vm870_vm4, %v869_v14 }
  0xb6   : > { %874 = vmatpush1.bf16.msk.msra.mxu0 %vm873_vm5, %v872_v15 }
  0xb7   : > { %833 = vmatprep.subr.msk.mxu0 %vm300_vm6, %v1102_v16 }
  0xba   : > { %834 = vmatpush1.msk.msra.mxu0 %vm300_vm6, %v1102_v16 }
  0xbb   : > { %835 = vmatmul.mubr.msk.f32.vlgmr.msra.gmra.mrb[0].mxu0 %vm287_vm7, %v243_v17 }
  0xbc   : > { %374 = vmatprep.mubr.f32.mxu0 %v1099_v2 }
  0xbf   : > { %836 = vmatmul.mubr.msk.f32.gmra.mrb[2].mxu0 %vm287_vm7, %v244_v18 }
  0xc0   : > { %380 = vmatprep.mubr.f32.mxu0 %v1099_v2 }
  0xc3   : > { %837 = vmatmul.mubr.msk.f32.gmra.mrb[4].mxu0 %vm287_vm7, %v245_v31 }
  0xc4   : > { %386 = vmatprep.mubr.f32.mxu0 %v1099_v2 }
  0xc7   : > { %838 = vmatmul.mubr.msk.f32.gmra.mrb[6].mxu0 %vm287_vm7, %v246_v32 }
  0xc8   : > { %705 = vmatprep.mubr.f32.mxu0 %v1099_v2 }
 0x18e   : > { %v370_v19 = vpop.f32.mrb[0].mxu0 }
 0x18f   : > { %v372_v20 = vpop.f32.mrb[1].mxu0  ;;  %v393_v22 = vmax.f32 %v370_v19, 0.0 }
 0x190   : > { %v394_v25 = vmax.f32 %v372_v20, 0.0 }
 0x192   : > { %v376_v21 = vpop.f32.mrb[2].mxu0 }
 0x193   : > { %v395_v23 = vmax.f32 %v376_v21, 0.0  ;;  %v378_v24 = vpop.f32.mrb[3].mxu0 }
 0x194   : > { %v396_v26 = vmax.f32 %v378_v24, 0.0  ;;  %v509_v24 = vld [vmem:[%s1446_s3] sm:$0xff] }
 0x195   : > { %v970_v27 = vpack.i.bf16 %v395_v23, %v393_v22  ;;  %v883_v28 = vpack.c.bf16 %v395_v23, %v393_v22 }
 0x196   : > { %v881_v29 = vpack.c.bf16 %v396_v26, %v394_v25  ;;  %v975_v30 = vpack.i.bf16 %v396_v26, %v394_v25  ;;  %v382_v47 = vpop.f32.mrb[4].mxu0  ;;  %v510_v25 = vld [vmem:[%s1446_s3 + $0x8] sm:$0xff] }
 0x197   : > { %971 = vrot.lane.b32.xlu0 %v970_v27, %s1100_s30  ;;  %v384_v48 = vpop.f32.mrb[5].mxu0 }
 0x198   : > { %976 = vrot.lane.b32.xlu1 %v975_v30, %s1100_s30 }
 0x19a   : > { %v388_v49 = vpop.f32.mrb[6].mxu0 }
 0x19b   : > { %v390_v50 = vpop.f32.mrb[7].mxu0 }
 0x209   : > { %v972_v33 = vpop.permute.xlu0 %971 }
 0x20a   : > { %v974_v34 = vunpack.i.h.bf16 %v972_v33  ;;  %v973_v35 = vunpack.i.l.bf16 %v972_v33  ;;  %v977_v36 = vpop.permute.xlu1 %976 }
 0x20b   : > { %v979_v37 = vunpack.i.h.bf16 %v977_v36  ;;  %v978_v38 = vunpack.i.l.bf16 %v977_v36 }
 0x20d   : > { %v405_v39 = vsel %vm280_vm0, %v973_v35, %v978_v38  ;;  %v406_v40 = vsel %vm280_vm0, %v974_v34, %v979_v37  ;;  %v407_v41 = vsel %vm280_vm0, %v978_v38, %v973_v35  ;;  %v408_v42 = vsel %vm280_vm0, %v979_v37, %v974_v34 }
 0x20e   : > { %v875_v43 = vpack.c.bf16 %v406_v40, %v405_v39  ;;  %v878_v44 = vpack.c.bf16 %v408_v42, %v407_v41 }
 0x210   : > { %877 = vmatprep.subr.msk.bf16.mxu1 %vm876_vm8, %v875_v43 }
 0x211   : > { %880 = vmatpush1.bf16.msk.msra.mxu1 %vm879_vm9, %v878_v44 }
 0x212   : > { %882 = vmatprep.subr.bf16.mxu1 %v881_v29 }
 0x215   : > { %884 = vmatpush1.bf16.msra.mxu1 %v883_v28 }
 0x216   : > { %843 = vmatprep.subr.msk.mxu1 %vm300_vm6, %v1102_v16 }
 0x219   : > { %844 = vmatpush1.msk.msra.mxu1 %vm300_vm6, %v1102_v16 }
 0x21a   : > { %845 = vmatmul.mubr.msk.f32.vlgmr.msra.gmra.mrb[0].mxu1 %vm413_vm10, %v247_v45 }
 0x21b   : > { %490 = vmatprep.mubr.f32.mxu1 %v1099_v2 }
 0x21e   : > { %846 = vmatmul.mubr.msk.f32.gmra.mrb[2].mxu1 %vm413_vm10, %v248_v46 }
 0x21f   : > { %602 = vmatprep.mubr.f32.mxu1 %v1099_v2 }
 0x2ed   : > { %v486_v51 = vpop.f32.mrb[0].mxu1 }
 0x2ee   : > { %v497_v52 = vmax.f32 %v486_v51, 0.0  ;;  %v488_v53 = vpop.f32.mrb[1].mxu1 }
 0x2ef   : > { %v498_v54 = vmax.f32 %v488_v53, 0.0 }
 0x2f0   : > { %v501_v55 = vadd.f32 %v497_v52, %v382_v47 }
 0x2f1   : > { %v502_v56 = vadd.f32 %v498_v54, %v384_v48  ;;  %v492_v57 = vpop.f32.mrb[2].mxu1 }
 0x2f2   : > { %v499_v58 = vmax.f32 %v492_v57, 0.0  ;;  %v494_v59 = vpop.f32.mrb[3].mxu1  ;;  %v1304_v63 = vmax.f32 %v501_v55, 0.0 }
 0x2f3   : > { %v500_v60 = vmax.f32 %v494_v59, 0.0  ;;  %v1308_v1 = vmax.f32 %v502_v56, 0.0 }
 0x2f4   : > { %v503_v61 = vadd.f32 %v499_v58, %v388_v49 }
 0x2f5   : > { %v504_v62 = vadd.f32 %v500_v60, %v390_v50  ;;  %v511_v50 = vld [vmem:[#allocation2] sm:$0xff] }
 0x2f6   : > { %v1306_v0 = vmax.f32 %v503_v61, 0.0 }
 0x2f7   : > { %v1310_v3 = vmax.f32 %v504_v62, 0.0 }
 0x2f8   : > { %v980_v4 = vpack.i.bf16 %v1306_v0, %v1304_v63  ;;  %v893_v23 = vpack.c.bf16 %v1306_v0, %v1304_v63 }
 0x2f9   : > { %v985_v8 = vpack.i.bf16 %v1310_v3, %v1308_v1  ;;  %v891_v22 = vpack.c.bf16 %v1310_v3, %v1308_v1 }
 0x2fa   : > { %981 = vrot.lane.b32.xlu1 %v980_v4, %s1103_s10 }
 0x2fb   : > { %986 = vrot.lane.b32.xlu0 %v985_v8, %s1103_s10 }
 0x36c   : > { %v982_v9 = vpop.permute.xlu1 %981 }
 0x36d   : > { %v984_v10 = vunpack.i.h.bf16 %v982_v9  ;;  %v983_v11 = vunpack.i.l.bf16 %v982_v9  ;;  %v987_v12 = vpop.permute.xlu0 %986 }
 0x36e   : > { %v989_v14 = vunpack.i.h.bf16 %v987_v12  ;;  %v988_v15 = vunpack.i.l.bf16 %v987_v12 }
 0x370   : > { %v523_v17 = vsel %vm521_vm11, %v984_v10, %v989_v14  ;;  %v525_v18 = vsel %vm521_vm11, %v989_v14, %v984_v10  ;;  %v522_v19 = vsel %vm521_vm11, %v983_v11, %v988_v15  ;;  %v524_v6 = vsel %vm521_vm11, %v988_v15, %v983_v11 }
 0x371   : > { %v885_v7 = vpack.c.bf16 %v523_v17, %v522_v19  ;;  %v888_v20 = vpack.c.bf16 %v525_v18, %v524_v6 }
 0x373   : > { %887 = vmatprep.subr.msk.bf16.mxu1 %vm886_vm14, %v885_v7 }
 0x374   : > { %890 = vmatpush1.bf16.msk.msra.mxu1 %vm1337_vm15, %v888_v20 }
 0x375   : > { %892 = vmatprep.subr.bf16.mxu1 %v891_v22 }
 0x378   : > { %894 = vmatpush1.bf16.msra.mxu1 %v893_v23 }
 0x379   : > { %851 = vmatprep.subr.msk.mxu1 %vm300_vm6, %v1102_v16 }
 0x37c   : > { %852 = vmatpush1.msk.msra.mxu1 %vm300_vm6, %v1102_v16 }
 0x37d   : > { %853 = vmatmul.mubr.msk.f32.vlgmr.msra.gmra.mrb[4].mxu1 %vm413_vm10, %v509_v24 }
 0x37e   : > { %608 = vmatprep.mubr.f32.mxu1 %v1099_v2 }
 0x381   : > { %854 = vmatmul.mubr.msk.f32.gmra.mrb[6].mxu1 %vm413_vm10, %v510_v25 }
 0x450   : > { %v604_v26 = vpop.f32.mrb[4].mxu1 }
 0x451   : > { %v606_v27 = vpop.f32.mrb[5].mxu1  ;;  %v615_v29 = vmax.f32 %v604_v26, 0.0 }
 0x452   : > { %v616_v32 = vmax.f32 %v606_v27, 0.0 }
 0x454   : > { %v610_v28 = vpop.f32.mrb[6].mxu1 }
 0x455   : > { %v617_v30 = vmax.f32 %v610_v28, 0.0  ;;  %v612_v31 = vpop.f32.mrb[7].mxu1 }
 0x456   : > { %v618_v33 = vmax.f32 %v612_v31, 0.0 }
 0x457   : > { %v990_v34 = vpack.i.bf16 %v617_v30, %v615_v29  ;;  %v903_v35 = vpack.c.bf16 %v617_v30, %v615_v29 }
 0x458   : > { %v995_v36 = vpack.i.bf16 %v618_v33, %v616_v32  ;;  %v901_v37 = vpack.c.bf16 %v618_v33, %v616_v32 }
 0x459   : > { %991 = vrot.lane.b32.xlu1 %v990_v34, %s1103_s10 }
 0x45a   : > { %996 = vrot.lane.b32.xlu0 %v995_v36, %s1103_s10  ;;  %s1034_s10 = scalar_lea.vmem %s1033_s9, 1024 }
 0x45b   : > { %p1036_p3 = scmp.lt.s32.totalorder %s1034_s10, %s1028_s26 }
 0x45d   : > { %p1037_p4 = por %p1036_p3, %p1035_p2 }
 0x45f   : > { %p1038_p7 = pnand %p1037_p4, %p1031_p12 }
 0x4cb   : > { %v992_v38 = vpop.permute.xlu1 %991 }
 0x4cc   : > { %v994_v39 = vunpack.i.h.bf16 %v992_v38  ;;  %v993_v40 = vunpack.i.l.bf16 %v992_v38  ;;  %v997_v41 = vpop.permute.xlu0 %996 }
 0x4cd   : > { %v999_v42 = vunpack.i.h.bf16 %v997_v41  ;;  %v998_v43 = vunpack.i.l.bf16 %v997_v41 }
 0x4cf   : > { %v628_v44 = vsel %vm521_vm11, %v994_v39, %v999_v42  ;;  %v630_v45 = vsel %vm521_vm11, %v999_v42, %v994_v39  ;;  %v627_v46 = vsel %vm521_vm11, %v993_v40, %v998_v43  ;;  %v629_v47 = vsel %vm521_vm11, %v998_v43, %v993_v40 }
 0x4d0   : > { %v895_v48 = vpack.c.bf16 %v628_v44, %v627_v46  ;;  %v898_v49 = vpack.c.bf16 %v630_v45, %v629_v47 }
 0x4d2   : > { %897 = vmatprep.subr.msk.bf16.mxu0 %vm886_vm14, %v895_v48 }
 0x4d3   : > { %900 = vmatpush1.bf16.msk.msra.mxu0 %vm1337_vm15, %v898_v49 }
 0x4d4   : > { %902 = vmatprep.subr.bf16.mxu0 %v901_v37 }
 0x4d7   : > { %904 = vmatpush1.bf16.msra.mxu0 %v903_v35 }
 0x4d8   : > { %859 = vmatprep.subr.msk.mxu0 %vm300_vm6, %v1102_v16 }
 0x4db   : > { %860 = vmatpush1.msk.msra.mxu0 %vm300_vm6, %v1102_v16 }
 0x4dc   : > { %861 = vmatmul.mubr.msk.f32.vlgmr.msra.gmra.mrb[8].mxu0 %vm413_vm10, %v511_v50 }
 0x4dd   : > { %711 = vmatprep.mubr.f32.mxu0 %v1099_v2 }
 0x4e0   : > { %862 = vmatmul.mubr.msk.f32.gmra.mrb[10].mxu0 %vm413_vm10, %v512_v5 }
 0x5af   : > { %v707_v51 = vpop.f32.mrb[8].mxu0 }
 0x5b0   : > { %v718_v52 = vmax.f32 %v707_v51, 0.0  ;;  %v709_v53 = vpop.f32.mrb[9].mxu0 }
 0x5b1   : > { %v719_v54 = vmax.f32 %v709_v53, 0.0 }
 0x5b2   : > { %v722_v55 = vadd.f32 %v718_v52, %v1304_v63 }
 0x5b3   : > { %v723_v56 = vadd.f32 %v719_v54, %v1308_v1  ;;  %v713_v57 = vpop.f32.mrb[10].mxu0 }
 0x5b4   : > { %v726_v16 = vmax.f32 %v722_v55, 0.0  ;;  %v720_v58 = vmax.f32 %v713_v57, 0.0  ;;  %v715_v2 = vpop.f32.mrb[11].mxu0 }
 0x5b5   : > { %v727_v59 = vmax.f32 %v723_v56, 0.0  ;;  %v721_v60 = vmax.f32 %v715_v2, 0.0 }
 0x5b6   : > { %730 = vst [vmem:[%s233_s14] sm:$0xff] %v726_v16  ;;  %v724_v61 = vadd.f32 %v720_v58, %v1306_v0 }
 0x5b7   : > { %731 = vst [vmem:[%s233_s14 + $0x8] sm:$0xff] %v727_v59  ;;  %v725_v62 = vadd.f32 %v721_v60, %v1310_v3 }
 0x5b8   : > { %v728_v63 = vmax.f32 %v724_v61, 0.0 }
 0x5b9   : > { %v729_v1 = vmax.f32 %v725_v62, 0.0 }
 0x5ba   : > { %732 = vst [vmem:[%s233_s14 + $0x10] sm:$0xff] %v728_v63 }
 0x5bb   : > { %733 = vst [vmem:[%s233_s14 + $0x18] sm:$0xff] %v729_v1 }
 0x5bc   : > { %1041 = shalt.err (!%p1038_p7)
}
 0x5bd   : > { %s1042_s8 = scalar_lea.hbm %s1400_s25, 512  ;;  %s1046_s7 = scalar_lea.hbm %s1448_s5, 1024 }
 0x5be   : > { %p1043_p8 = scmp.ne.s32.totalorder %s1400_s25, %s1042_s8  ;;  %p1047_p1 = scmp.lt.u32.totalorder %s1400_s25, %s1448_s5 }
 0x5bf   : > { %p1048_p0 = scmp.lt.u32.totalorder %s1046_s7, %s1042_s8  ;;  %p1050_p6 = scmp.lt.u32.totalorder %s1042_s8, %s1400_s25 }
 0x5c0   : > { %p1044_p11 = pnand %p1043_p8, %p1465_p9 }
 0x5c1   : > { %p1049_p5 = por %p1048_p0, %p1047_p1 }
 0x5c2   : > { %p1045_p13 = pneg %p1044_p11 }
 0x5c3   : > { %p1051_p10 = por %p1050_p6, %p1049_p5 }
 0x5c5   : > { %p1052_p12 = pnand %p1051_p10, %p1045_p13 }
 0x5c7   : > { %1055 = shalt.err (!%p1052_p12)
}
 0x5c8   : > { %s1105_s14 = smov 256   ;;  %s1106_s16 = smov 512  }
 0x5c9   : > { %s1107_s17 = smov 16  }
 0x5ca   : > { %909 = dma.vmem_to_hbm [thread:$0]  (%p1465_p9), %s1394_s15, 512, %s1400_s25, %s1402_s22, %s1105_s14, %s1106_s16, %s1107_s17  }
 0x5cb PF: > { %p921_p2 = scmp.ge.s32.totalorder %s1094_s21, 2  ;;  %s763_s23 = sand.u32 1, %s1082_s18  }
 0x5cc   : > { %p1466_p3 = scmp.ne.s32.totalorder %s1453_s29, 0  ;;  %s764_s26 = scalar_lea.sflag [#allocation4], %s763_s23 }
 0x5ce   : > { %p916_p4 = pnand %p921_p2, %p1466_p3 }
 0x5d0   : > { %1077 = dma.done.wait (!%p916_p4), %s764_s26, 512  }
 0x5d1   : > { %1079 = vsyncadd (!%p916_p4), %s764_s26, 4294966784  ;;  %p16_p7 = scmp.ge.s32.totalorder %s1163_s24, 4   ;;  %s1467_s18 = smov %s1086_s19 }
 0x5d2   : > { %s1468_s19 = smov %s1090_s20  ;;  %s1469_s20 = smov %s1174_s27 }
 0x5d3   : > { %s1470_s21 = smov %s1163_s24  ;;  %18 = sbr.rel (!%p16_p7) target bundleno = 4 (0x4), region = 80 }
 0x5da   :  { %769 = vsyncpa [#allocation3], 1 }
 0x5db   :  { %771 = vsyncpa [#allocation3 + $0x1], 1 }
 0x5dc   :  { %772 = vsyncpa [#allocation4], 1 }
 0x5dd   :  { %774 = vsyncpa [#allocation4 + $0x1], 1 }

</bundles_post_ra>
